<compile_context>
chip_gen: v5e
topology: v5e:2x2
jax: 0.10.0
libtpu: 0.0.40
codegen_flags: <defaults>
</compile_context>

<pallas_src>
import math

import jax
import jax.numpy as jnp
from jax.experimental import pallas as pl
from jax.experimental.pallas import tpu as pltpu


def _round_up(x, m):
    return ((x + m - 1) // m) * m


def temperature_scale_kernel(temp_ref, x_ref, w_ref, b_ref, o_ref):
    """Fused: out = (x @ W + b) * (1 / temperature).

    temp_ref : SMEM (1,)      f32   temperature parameter (init 1.5)
    x_ref    : VMEM (TM, D)   f32   one batch tile of the flattened input
    w_ref    : VMEM (D,  Kp)  bf16  classifier weight (resident, single-buffered)
    b_ref    : VMEM (1,  Kp)  f32   classifier bias (zero in padded columns)
    o_ref    : VMEM (TM, Kp)  f32   temperature-scaled logits tile
    """
    # Scalar reciprocal once per tile -> epilogue is a multiply, not a divide.
    inv_t = 1.0 / temp_ref[0]
    # Cast f32 -> bf16 on the VPU inside the kernel (free filler under DMA/MXU);
    # this keeps the HBM read of x at 4 B/elem with no wrapper-side extra pass.
    x_bf = x_ref[...].astype(jnp.bfloat16)
    logits = jnp.dot(x_bf, w_ref[...], preferred_element_type=jnp.float32)
    o_ref[...] = (logits + b_ref[...]) * inv_t


def model_with_temperature_forward(x_nchw, weight, bias, temperature):
    """JAX wrapper reproducing ModelWithTemperature.forward semantics."""
    n = x_nchw.shape[0]
    d = math.prod(x_nchw.shape[1:])
    k = weight.shape[1]

    kp = _round_up(k, 128)                    # lane-dense output (unmasked vst)

    # ---- boundary glue (x: flatten only — a view; no cast, no padding) ------
    x2d = x_nchw.reshape(n, d)                # == torch .view(N, -1); stays f32
    w_bf = jnp.pad(weight.astype(jnp.bfloat16), ((0, 0), (0, kp - k)))
    b_f32 = jnp.pad(bias.astype(jnp.float32), (0, kp - k)).reshape(1, kp)
    temp = temperature.reshape(1).astype(jnp.float32)

    # ---- batch tile from an explicit VMEM budget (includes W and bias) ------
    vmem_limit = 48 << 20                     # < v7x 64 MiB physical, > v5e/v6e defaults
    w_bytes = d * kp * 2                      # bf16 W, single-buffered (Buffered(1))
    b_bytes = kp * 4                          # bias, single-buffered
    tile_budget = vmem_limit - w_bytes - b_bytes - (4 << 20)   # compiler headroom
    per_row_bytes = 2 * d * 4 + 2 * kp * 4    # double-buffered f32 x tile + f32 out tile
    tm = tile_budget // per_row_bytes if tile_budget > 0 else 8
    tm = max(8, min(1024, (tm // 8) * 8))
    tm = min(tm, _round_up(n, 8))             # never larger than the (8-aligned) batch
    if n > 8:
        # Keep >=2 grid steps so both v7x TensorCores get work under "parallel".
        tm = min(tm, max(8, _round_up((n + 1) // 2, 8)))

    grid = (pl.cdiv(n, tm),)                  # partial last block handled by Pallas

    cost = pl.CostEstimate(
        flops=2 * n * d * kp,
        transcendentals=0,
        bytes_accessed=n * d * 4 + d * kp * 2 + kp * 4 + n * kp * 4,
    )

    # TODO(synk): if D grows so large that bf16 W (d*kp*2 bytes) no longer fits the
    # VMEM budget (threshold halves on v7x), add a last "arbitrary" reduction grid
    # axis over D (tiles of 512-1024) with a (tm, kp) f32 accumulator scratch and
    # pl.when init/finalize.
    out_padded = pl.pallas_call(
        temperature_scale_kernel,
        out_shape=jax.ShapeDtypeStruct((n, kp), jnp.float32),
        grid=grid,
        in_specs=[
            pl.BlockSpec(memory_space=pltpu.MemorySpace.SMEM),        # temperature
            pl.BlockSpec((tm, d), lambda i: (i, 0)),                  # x tile (f32)
            pl.BlockSpec((d, kp), lambda i: (0, 0),
                         pipeline_mode=pl.Buffered(1)),               # W resident
            pl.BlockSpec((1, kp), lambda i: (0, 0),
                         pipeline_mode=pl.Buffered(1)),               # bias resident
        ],
        out_specs=pl.BlockSpec((tm, kp), lambda i: (i, 0)),
        compiler_params=pltpu.CompilerParams(
            dimension_semantics=("parallel",),
            vmem_limit_bytes=vmem_limit,
        ),
        cost_estimate=cost,
    )(temp, x2d, w_bf, b_f32)

    # Slice off class padding before any downstream softmax / NLL.
    # (Padded columns are exactly 0: zero W columns + zero bias.)
    return out_padded[:, :k]


if __name__ == "__main__":
    # Small deterministic example consistent with the module's forward.
    N, C, H, W = 2, 4, 16, 16          # batch of NCHW images
    NUM_CLASSES = 10
    D = C * H * W

    key = jax.random.PRNGKey(0)
    kx, kw, kb = jax.random.split(key, 3)

    x = jax.random.normal(kx, (N, C, H, W), dtype=jnp.float32)

    # Deterministic synthetic "model" parameters (stand-in for self.model).
    weight = jax.random.normal(kw, (D, NUM_CLASSES), dtype=jnp.float32) * 0.02
    bias = jax.random.normal(kb, (NUM_CLASSES,), dtype=jnp.float32) * 0.01

    # nn.Parameter(torch.ones(1) * 1.5)
    temperature = jnp.ones((1,), dtype=jnp.float32) * 1.5

    out = model_with_temperature_forward(x, weight, bias, temperature)
    out = jax.block_until_ready(out)

    # Reference with the same bf16-operand / f32-accumulate MXU math.
    x2d = x.reshape(N, D)
    ref_bf16 = (jnp.dot(x2d.astype(jnp.bfloat16), weight.astype(jnp.bfloat16),
                        preferred_element_type=jnp.float32)
                + bias) / temperature[0]
    # Full-precision reference (module semantics).
    ref_f32 = (x2d @ weight + bias) / temperature[0]

    assert out.shape == (N, NUM_CLASSES)
    assert jnp.allclose(out, ref_bf16, atol=2e-3, rtol=2e-3)
    assert jnp.allclose(out, ref_f32, atol=5e-2, rtol=5e-2)

    print("KERNEL_OK")
</pallas_src>

<mosaic_0001>
module attributes {stable_mosaic.version = 11 : i64} {
  func.func @temperature_scale_kernel(%arg0: i32, %arg1: memref<1xf32, #tpu.memory_space<smem>>, %arg2: memref<8x1024xf32, #tpu.memory_space<vmem>>, %arg3: memref<1024x128xbf16, #tpu.memory_space<vmem>>, %arg4: memref<1x128xf32, #tpu.memory_space<vmem>>, %arg5: memref<8x128xf32, #tpu.memory_space<vmem>>) attributes {dimension_semantics = [#tpu.dimension_semantics<parallel>], iteration_bounds = array<i64: 1>, scalar_prefetch = 0 : i64, scratch_operands = 0 : i64, tpu.core_type = #tpu.core_type<tc>, window_params = [{transform_indices = @transform_0, window_bounds = array<i64: 1>}, {transform_indices = @transform_1, window_bounds = array<i64: 8, 1024>}, {pipeline_mode = #tpu.pipeline_mode<synchronous>, transform_indices = @transform_2, window_bounds = array<i64: 1024, 128>}, {pipeline_mode = #tpu.pipeline_mode<synchronous>, transform_indices = @transform_3, window_bounds = array<i64: 1, 128>}, {transform_indices = @transform_4, window_bounds = array<i64: 8, 128>}]} {
    %c0 = arith.constant 0 : index
    %0 = memref.load %arg1[%c0] : memref<1xf32, #tpu.memory_space<smem>>
    %cst = arith.constant 1.000000e+00 : f32
    %1 = arith.divf %cst, %0 : f32
    %c0_0 = arith.constant 0 : index
    %c0_1 = arith.constant 0 : index
    %2 = vector.load %arg2[%c0_0, %c0_1] : memref<8x1024xf32, #tpu.memory_space<vmem>>, vector<8x1024xf32>
    %3 = arith.truncf %2 : vector<8x1024xf32> to vector<8x1024xbf16>
    %c0_2 = arith.constant 0 : index
    %c0_3 = arith.constant 0 : index
    %4 = vector.load %arg3[%c0_2, %c0_3] : memref<1024x128xbf16, #tpu.memory_space<vmem>>, vector<1024x128xbf16>
    %cst_4 = arith.constant dense<0.000000e+00> : vector<8x128xf32>
    %5 = tpu.matmul %3, %4, %cst_4 {dimension_numbers = #tpu.dot_dimension_numbers<[1], [0], [0], [1], [0, 0, 1, 1], [], []>} : vector<8x1024xbf16>, vector<1024x128xbf16>, vector<8x128xf32> -> vector<8x128xf32>
    %c0_5 = arith.constant 0 : index
    %c0_6 = arith.constant 0 : index
    %6 = vector.load %arg4[%c0_5, %c0_6] : memref<1x128xf32, #tpu.memory_space<vmem>>, vector<1x128xf32>
    %7 = vector.broadcast %6 : vector<1x128xf32> to vector<8x128xf32>
    %8 = arith.addf %5, %7 : vector<8x128xf32>
    %9 = vector.broadcast %1 : f32 to vector<8x128xf32>
    %10 = arith.mulf %8, %9 : vector<8x128xf32>
    %c0_7 = arith.constant 0 : index
    %c0_8 = arith.constant 0 : index
    %11 = vector.load %arg5[%c0_7, %c0_8] : memref<8x128xf32, #tpu.memory_space<vmem>>, vector<8x128xf32>
    tpu.vector_store %arg5[%c0_7, %c0_8], %10 {strides = array<i32>} : memref<8x128xf32, #tpu.memory_space<vmem>>, vector<8x128xf32>,
    return
  }
  func.func @transform_0(%arg0: i32) -> i32 {
    %c0_i32 = arith.constant 0 : i32
    %c0_i32_0 = arith.constant 0 : i32
    return %c0_i32 : i32
  }
  func.func @transform_1(%arg0: i32) -> (i32, i32) {
    %c0_i32 = arith.constant 0 : i32
    %c0_i32_0 = arith.constant 0 : i32
    return %arg0, %c0_i32 : i32, i32
  }
  func.func @transform_2(%arg0: i32) -> (i32, i32) {
    %c0_i32 = arith.constant 0 : i32
    %c0_i32_0 = arith.constant 0 : i32
    %c0_i32_1 = arith.constant 0 : i32
    return %c0_i32, %c0_i32_0 : i32, i32
  }
  func.func @transform_3(%arg0: i32) -> (i32, i32) {
    %c0_i32 = arith.constant 0 : i32
    %c0_i32_0 = arith.constant 0 : i32
    %c0_i32_1 = arith.constant 0 : i32
    return %c0_i32, %c0_i32_0 : i32, i32
  }
  func.func @transform_4(%arg0: i32) -> (i32, i32) {
    %c0_i32 = arith.constant 0 : i32
    %c0_i32_0 = arith.constant 0 : i32
    return %arg0, %c0_i32 : i32, i32
  }
}

</mosaic_0001>

<bundles_post_ra>
// kernel: tpu_custom_call.1
= control target key start
LH: loop header
LB: loop body
LE: loop exit
PB: predicated region body
PF: predicated region fallthrough
CT: control target
= control target key end

     0   :  { %10 = vsyncpa [#allocation4], 0  ;;  %s1227_s0 = inlined_call_operand.<no memory space> [shape: f32[1], index: 0, kind: input, shape index: {}]   ;;  %s1228_s1 = inlined_call_operand.hbm [shape: f32[2,1024], index: 1, kind: input, shape index: {}]   ;;  %s1229_s2 = inlined_call_operand.hbm [shape: bf16[1024,128], index: 2, kind: input, shape index: {}]   ;;  %s1230_s3 = inlined_call_operand.vmem [shape: f32[1,128], index: 3, kind: input, shape index: {}]   ;;  %s1231_s4 = inlined_call_operand.hbm [shape: f32[2,128], index: 4, kind: output, shape index: {}]  }
   0x1   :  { %11 = vsyncpa [#allocation7], 0 }
   0x2   :  { %12 = vsyncpa [#allocation5], 0 }
   0x3   :  { %18 = vsyncadd [#allocation4], 768  ;;  %s19_s17 = sshll.u32 %s1228_s1, 4  ;;  %s1178_s18 = smov [#allocation3]   ;;  %s20_s17 = int_to_ptr.hbm [resolvable:$true] %s19_s17 }
   0x4   :  { %s21_s19 = sshll.u32 %s1178_s18, 4  ;;  %s32_s22 = sshll.u32 %s1229_s2, 4  ;;  %s22_s19 = int_to_ptr.vmem [resolvable:$true] %s21_s19  ;;  %s33_s22 = int_to_ptr.hbm [resolvable:$true] %s32_s22 }
   0x5   :  { %s1179_s23 = smov 256   ;;  %s1180_s24 = smov 16  }
   0x6   :  { %27 = dma.hbm_to_vmem [thread:$0]  %s20_s17, 256, %s22_s19, [#allocation4], %s1179_s23, %s1179_s23, %s1180_s24  }
   0x7   :  { %s1181_s25 = smov [#allocation6]   ;;  %s1182_s27 = smov 64  }
   0x8   :  { %s34_s26 = sshll.u32 %s1181_s25, 4  ;;  %s1183_s28 = smov 4   ;;  %s35_s26 = int_to_ptr.vmem [resolvable:$true] %s34_s26 }
   0x9   :  { %40 = dma.hbm_to_vmem [thread:$0]  %s33_s22, 8192, %s35_s26, [#allocation7], %s1182_s27, %s1182_s27, %s1183_s28  }
   0xa   :  { %1172 = dma.done.wait [#allocation4], 1024  }
   0xb   :  { %1173 = vsyncadd [#allocation4], 4294966272 }
   0xc   :  { %1174 = dma.done.wait [#allocation7], 8192  }
   0xd   :  { %1175 = vsyncadd [#allocation7], 4294959104  ;;  %v1029_v0 = vld [vmem:[#allocation6 + $0x38] sm:$0xff]  ;;  %v1028_v4 = vld [vmem:[#allocation6 + $0x30] sm:$0xff]  ;;  %v52_v54 = vstv %s1227_s0 }
   0xe   :  { %v1037_v1 = vld [vmem:[#allocation6 + $0x78] sm:$0xff]  ;;  %639 = vmatpush.bf16.msra.mxu0 %v1029_v0  ;;  %v1036_v5 = vld [vmem:[#allocation6 + $0x70] sm:$0xff]  ;;  %v1027_v8 = vld [vmem:[#allocation6 + $0x28] sm:$0xff]  ;;  %1098 = vrcp.f32 %v52_v54  ;;  %vm58_vm0 = vweird.f32 %v52_v54 }
   0xf   :  { %v1045_v2 = vld [vmem:[#allocation6 + $0xb8] sm:$0xff]  ;;  %652 = vmatpush.bf16.msra.mxu1 %v1037_v1  ;;  %v1044_v6 = vld [vmem:[#allocation6 + $0xb0] sm:$0xff]  ;;  %v1035_v9 = vld [vmem:[#allocation6 + $0x68] sm:$0xff] }
  0x10   :  { %v1053_v3 = vld [vmem:[#allocation6 + $0xf8] sm:$0xff]  ;;  %665 = vmatpush.bf16.msra.mxu2 %v1045_v2  ;;  %v1052_v7 = vld [vmem:[#allocation6 + $0xf0] sm:$0xff]  ;;  %v1043_v10 = vld [vmem:[#allocation6 + $0xa8] sm:$0xff] }
  0x11   :  { %678 = vmatpush.bf16.msra.mxu3 %v1053_v3  ;;  %v1051_v11 = vld [vmem:[#allocation6 + $0xe8] sm:$0xff]  ;;  %v1026_v12 = vld [vmem:[#allocation6 + $0x20] sm:$0xff]  ;;  %v1025_v16 = vld [vmem:[#allocation6 + $0x18] sm:$0xff]  ;;  %v64_v3 = vand.u32 2147483648, %v52_v54 }
  0x12   :  { %640 = vmatpush.bf16.msra.mxu0 %v1028_v4  ;;  %v1034_v13 = vld [vmem:[#allocation6 + $0x60] sm:$0xff]  ;;  %v70_v18 = vld [vmem:[#allocation3 + $0x10] sm:$0xff]  ;;  %v1033_v19 = vld [vmem:[#allocation6 + $0x58] sm:$0xff] }
  0x13   :  { %653 = vmatpush.bf16.msra.mxu1 %v1036_v5  ;;  %v1042_v14 = vld [vmem:[#allocation6 + $0xa0] sm:$0xff]  ;;  %v74_v21 = vld [vmem:[#allocation3 + $0x30] sm:$0xff]  ;;  %v1041_v22 = vld [vmem:[#allocation6 + $0x98] sm:$0xff]  ;;  %86 = vst [vmem:[#allocation1 + $0x1] ss:$4 sm:$0xff] %v70_v18 }
  0x14   :  { %666 = vmatpush.bf16.msra.mxu2 %v1044_v6  ;;  %v1050_v15 = vld [vmem:[#allocation6 + $0xe0] sm:$0xff]  ;;  %v1049_v23 = vld [vmem:[#allocation6 + $0xd8] sm:$0xff]  ;;  %90 = vst [vmem:[#allocation1 + $0x3] ss:$4 sm:$0xff] %v74_v21  ;;  %v1024_v24 = vld [vmem:[#allocation6 + $0x10] sm:$0xff]  ;;  %v1099_v61 = vpop.eup %1098 }
  0x15   :  { %679 = vmatpush.bf16.msra.mxu3 %v1052_v7  ;;  %v68_v17 = vld [vmem:[#allocation3] sm:$0xff]  ;;  %v1032_v25 = vld [vmem:[#allocation6 + $0x50] sm:$0xff]  ;;  %v69_v28 = vld [vmem:[#allocation3 + $0x8] sm:$0xff]  ;;  %v54_v0 = vmul.f32 %v1099_v61, %v52_v54  ;;  %vm59_vm1 = vweird.f32 %v1099_v61  ;;  %v62_v5 = vand.u32 2147483647, %v52_v54 }
  0x16   :  { %641 = vmatpush.bf16.msra.mxu0 %v1027_v8  ;;  %v72_v20 = vld [vmem:[#allocation3 + $0x20] sm:$0xff]  ;;  %84 = vst [vmem:[#allocation1] ss:$4 sm:$0xff] %v68_v17  ;;  %v1040_v26 = vld [vmem:[#allocation6 + $0x90] sm:$0xff]  ;;  %v71_v29 = vld [vmem:[#allocation3 + $0x18] sm:$0xff] }
  0x17   :  { %654 = vmatpush.bf16.msra.mxu1 %v1035_v9  ;;  %88 = vst [vmem:[#allocation1 + $0x2] ss:$4 sm:$0xff] %v72_v20  ;;  %v1048_v27 = vld [vmem:[#allocation6 + $0xd0] sm:$0xff]  ;;  %v1023_v30 = vld [vmem:[#allocation6 + $0x8] sm:$0xff]  ;;  %v1022_v35 = vld [vmem:[#allocation6] sm:$0xff]  ;;  %v55_v4 = vsub.f32 1.0, %v54_v0 }
  0x18   :  { %667 = vmatpush.bf16.msra.mxu2 %v1043_v10  ;;  %v1031_v31 = vld [vmem:[#allocation6 + $0x48] sm:$0xff]  ;;  %92 = vst [vmem:[#allocation1 + $0x20] ss:$4 sm:$0xff] %v69_v28  ;;  %v75_v36 = vld [vmem:[#allocation3 + $0x38] sm:$0xff]  ;;  %v1030_v37 = vld [vmem:[#allocation6 + $0x40] sm:$0xff]  ;;  %vm63_vm3 = vcmp.eq.f32.partialorder %v62_v5, 8.507059e+37 }
  0x19   :  { %680 = vmatpush.bf16.msra.mxu3 %v1051_v11  ;;  %v1039_v32 = vld [vmem:[#allocation6 + $0x88] sm:$0xff]  ;;  %94 = vst [vmem:[#allocation1 + $0x21] ss:$4 sm:$0xff] %v71_v29  ;;  %v1038_v38 = vld [vmem:[#allocation6 + $0x80] sm:$0xff]  ;;  %v1061_v40 = vld [vmem:[#allocation6 + $0x138] sm:$0xff]  ;;  %v56_v8 = vmul.f32 %v1099_v61, %v55_v4  ;;  %v65_v11 = vor.u32 1.1754944e-38, %v64_v3 }
  0x1a   :  { %642 = vmatpush.bf16.msra.mxu0 %v1026_v12  ;;  %v1047_v33 = vld [vmem:[#allocation6 + $0xc8] sm:$0xff]  ;;  %v1046_v39 = vld [vmem:[#allocation6 + $0xc0] sm:$0xff]  ;;  %v1069_v42 = vld [vmem:[#allocation6 + $0x178] sm:$0xff]  ;;  %98 = vst [vmem:[#allocation1 + $0x23] ss:$4 sm:$0xff] %v75_v36 }
  0x1b   :  { %655 = vmatpush.bf16.msra.mxu1 %v1034_v13  ;;  %v73_v34 = vld [vmem:[#allocation3 + $0x28] sm:$0xff]  ;;  %v1077_v46 = vld [vmem:[#allocation6 + $0x1b8] sm:$0xff]  ;;  %v1060_v52 = vld [vmem:[#allocation6 + $0x130] sm:$0xff]  ;;  %v57_v12 = vadd.f32 %v1099_v61, %v56_v8 }
  0x1c   :  { %668 = vmatpush.bf16.msra.mxu2 %v1042_v14  ;;  %96 = vst [vmem:[#allocation1 + $0x22] ss:$4 sm:$0xff] %v73_v34  ;;  %v1085_v47 = vld [vmem:[#allocation6 + $0x1f8] sm:$0xff]  ;;  %v1068_v53 = vld [vmem:[#allocation6 + $0x170] sm:$0xff]  ;;  %v1059_v57 = vld [vmem:[#allocation6 + $0x128] sm:$0xff] }
  0x1d   :  { %681 = vmatpush.bf16.msra.mxu3 %v1050_v15  ;;  %v1076_v55 = vld [vmem:[#allocation6 + $0x1b0] sm:$0xff]  ;;  %v1067_v58 = vld [vmem:[#allocation6 + $0x168] sm:$0xff]  ;;  %v1058_v62 = vld [vmem:[#allocation6 + $0x120] sm:$0xff] }
  0x1e   :  { %643 = vmatpush.bf16.msra.mxu0 %v1025_v16  ;;  %v101_v41 = vld.sshfl [vmem:[#allocation1 + $0x10] sm:$0xff pattern:$0x73625140]  ;;  %v102_v43 = vld.sshfl [vmem:[#allocation1 + $0x18] sm:$0xff pattern:$0x73625140]  ;;  %vm60_vm2 = vmor %vm58_vm0, %vm59_vm1 }
  0x1f   :  { %656 = vmatpush.bf16.msra.mxu1 %v1033_v19  ;;  %v99_v44 = vld.sshfl [vmem:[#allocation1] sm:$0xff pattern:$0x73625140]  ;;  %v100_v45 = vld.sshfl [vmem:[#allocation1 + $0x8] sm:$0xff pattern:$0x73625140]  ;;  %v117_v48 = vpack.c.bf16 %v101_v41, %v101_v41  ;;  %v118_v49 = vpack.c.bf16 %v102_v43, %v102_v43  ;;  %v61_v15 = vsel %vm60_vm2, %v1099_v61, %v57_v12 }
  0x20   :  { %669 = vmatpush.bf16.msra.mxu2 %v1041_v22  ;;  %v115_v50 = vpack.c.bf16 %v99_v44, %v99_v44  ;;  %v116_v51 = vpack.c.bf16 %v100_v45, %v100_v45  ;;  %v1084_v56 = vld [vmem:[#allocation6 + $0x1f0] sm:$0xff]  ;;  %v1075_v59 = vld [vmem:[#allocation6 + $0x1a8] sm:$0xff]  ;;  %v1066_v63 = vld [vmem:[#allocation6 + $0x160] sm:$0xff]  ;;  %v66_v18 = vsel %vm63_vm3, %v65_v11, %v61_v15 }
  0x21   :  { %682 = vmatpush.bf16.msra.mxu3 %v1049_v23  ;;  %v1083_v60 = vld [vmem:[#allocation6 + $0x1e8] sm:$0xff]  ;;  %v1074_v1 = vld [vmem:[#allocation6 + $0x1a0] sm:$0xff]  ;;  %v1057_v6 = vld [vmem:[#allocation6 + $0x118] sm:$0xff]  ;;  %1086 = vpush %v66_v18 }
  0x22   :  { %644 = vmatpush.bf16.msra.mxu0 %v1024_v24  ;;  %v1082_v2 = vld [vmem:[#allocation6 + $0x1e0] sm:$0xff]  ;;  %v1065_v7 = vld [vmem:[#allocation6 + $0x158] sm:$0xff]  ;;  %v1056_v13 = vld [vmem:[#allocation6 + $0x110] sm:$0xff] }
  0x23   :  { %657 = vmatpush.bf16.msra.mxu1 %v1032_v25  ;;  %v1073_v9 = vld [vmem:[#allocation6 + $0x198] sm:$0xff]  ;;  %v1064_v14 = vld [vmem:[#allocation6 + $0x150] sm:$0xff]  ;;  %v1055_v19 = vld [vmem:[#allocation6 + $0x108] sm:$0xff] }
  0x24   :  { %670 = vmatpush.bf16.msra.mxu2 %v1040_v26  ;;  %v1081_v10 = vld [vmem:[#allocation6 + $0x1d8] sm:$0xff]  ;;  %v1072_v16 = vld [vmem:[#allocation6 + $0x190] sm:$0xff]  ;;  %v1063_v20 = vld [vmem:[#allocation6 + $0x148] sm:$0xff] }
  0x25   :  { %683 = vmatpush.bf16.msra.mxu3 %v1048_v27  ;;  %v1080_v17 = vld [vmem:[#allocation6 + $0x1d0] sm:$0xff]  ;;  %v1071_v21 = vld [vmem:[#allocation6 + $0x188] sm:$0xff]  ;;  %v1054_v23 = vld [vmem:[#allocation6 + $0x100] sm:$0xff] }
  0x26   :  { %645 = vmatpush.bf16.msra.mxu0 %v1023_v30  ;;  %v1079_v22 = vld [vmem:[#allocation6 + $0x1c8] sm:$0xff]  ;;  %v1062_v24 = vld [vmem:[#allocation6 + $0x140] sm:$0xff]  ;;  %v103_v27 = vld.sshfl [vmem:[#allocation1 + $0x20] sm:$0xff pattern:$0x73625140] }
  0x27   :  { %658 = vmatpush.bf16.msra.mxu1 %v1031_v31  ;;  %v1070_v25 = vld [vmem:[#allocation6 + $0x180] sm:$0xff]  ;;  %v105_v29 = vld.sshfl [vmem:[#allocation1 + $0x30] sm:$0xff pattern:$0x73625140]  ;;  %v119_v31 = vpack.c.bf16 %v103_v27, %v103_v27  ;;  %v1097_v41 = vld [vmem:[%s1230_s3] ss:$0 sm:$0xff] }
  0x28   :  { %671 = vmatpush.bf16.msra.mxu2 %v1039_v32  ;;  %v1078_v26 = vld [vmem:[#allocation6 + $0x1c0] sm:$0xff]  ;;  %v106_v30 = vld.sshfl [vmem:[#allocation1 + $0x38] sm:$0xff pattern:$0x73625140] }
  0x29   :  { %684 = vmatpush.bf16.msra.mxu3 %v1047_v33  ;;  %v104_v28 = vld.sshfl [vmem:[#allocation1 + $0x28] sm:$0xff pattern:$0x73625140]  ;;  %v121_v33 = vpack.c.bf16 %v105_v29, %v105_v29  ;;  %v122_v34 = vpack.c.bf16 %v106_v30, %v106_v30 }
  0x2a   :  { %646 = vmatpush.bf16.msra.mxu0 %v1022_v35  ;;  %v120_v32 = vpack.c.bf16 %v104_v28, %v104_v28 }
  0x2b   :  { %659 = vmatpush.bf16.msra.mxu1 %v1030_v37 }
  0x2c   :  { %672 = vmatpush.bf16.msra.mxu2 %v1038_v38 }
  0x2d   :  { %685 = vmatpush.bf16.msra.mxu3 %v1046_v39  ;;  %647 = vmatmul.bf16.vlgmr.msra.gmra.mxu0 %v115_v50 }
  0x2e   :  { %691 = vmatpush.bf16.msrb.mxu0 %v1061_v40  ;;  %660 = vmatmul.bf16.vlgmr.msra.gmra.mxu1 %v116_v51 }
  0x2f   :  { %704 = vmatpush.bf16.msrb.mxu1 %v1069_v42  ;;  %673 = vmatmul.bf16.vlgmr.msra.gmra.mxu2 %v117_v48 }
  0x30   :  { %717 = vmatpush.bf16.msrb.mxu2 %v1077_v46  ;;  %686 = vmatmul.bf16.vlgmr.msra.gmra.mxu3 %v118_v49 }
  0x31   :  { %730 = vmatpush.bf16.msrb.mxu3 %v1085_v47 }
  0x32   :  { %692 = vmatpush.bf16.msrb.mxu0 %v1060_v52 }
  0x33   :  { %705 = vmatpush.bf16.msrb.mxu1 %v1068_v53 }
  0x34   :  { %718 = vmatpush.bf16.msrb.mxu2 %v1076_v55 }
  0x35   :  { %731 = vmatpush.bf16.msrb.mxu3 %v1084_v56 }
  0x36   :  { %693 = vmatpush.bf16.msrb.mxu0 %v1059_v57 }
  0x37   :  { %706 = vmatpush.bf16.msrb.mxu1 %v1067_v58 }
  0x38   :  { %719 = vmatpush.bf16.msrb.mxu2 %v1075_v59 }
  0x39   :  { %732 = vmatpush.bf16.msrb.mxu3 %v1083_v60 }
  0x3a   :  { %694 = vmatpush.bf16.msrb.mxu0 %v1058_v62 }
  0x3b   :  { %707 = vmatpush.bf16.msrb.mxu1 %v1066_v63 }
  0x3c   :  { %720 = vmatpush.bf16.msrb.mxu2 %v1074_v1 }
  0x3d   :  { %733 = vmatpush.bf16.msrb.mxu3 %v1082_v2 }
  0x3e   :  { %695 = vmatpush.bf16.msrb.mxu0 %v1057_v6 }
  0x3f   :  { %708 = vmatpush.bf16.msrb.mxu1 %v1065_v7 }
  0x40   :  { %721 = vmatpush.bf16.msrb.mxu2 %v1073_v9 }
  0x41   :  { %734 = vmatpush.bf16.msrb.mxu3 %v1081_v10 }
  0x42   :  { %696 = vmatpush.bf16.msrb.mxu0 %v1056_v13 }
  0x43   :  { %709 = vmatpush.bf16.msrb.mxu1 %v1064_v14 }
  0x44   :  { %722 = vmatpush.bf16.msrb.mxu2 %v1072_v16 }
  0x45   :  { %735 = vmatpush.bf16.msrb.mxu3 %v1080_v17 }
  0x46   :  { %697 = vmatpush.bf16.msrb.mxu0 %v1055_v19 }
  0x47   :  { %710 = vmatpush.bf16.msrb.mxu1 %v1063_v20 }
  0x48   :  { %723 = vmatpush.bf16.msrb.mxu2 %v1071_v21 }
  0x49   :  { %736 = vmatpush.bf16.msrb.mxu3 %v1079_v22 }
  0x4a   :  { %698 = vmatpush.bf16.msrb.mxu0 %v1054_v23 }
  0x4b   :  { %711 = vmatpush.bf16.msrb.mxu1 %v1062_v24 }
  0x4c   :  { %724 = vmatpush.bf16.msrb.mxu2 %v1070_v25 }
  0x4d   :  { %737 = vmatpush.bf16.msrb.mxu3 %v1078_v26  ;;  %699 = vmatmul.bf16.vlgmr.msrb.gmra.mxu0 %v119_v31 }
  0x4e   :  { %712 = vmatmul.bf16.vlgmr.msrb.gmra.mxu1 %v120_v32 }
  0x4f   :  { %725 = vmatmul.bf16.vlgmr.msrb.gmra.mxu2 %v121_v33 }
  0x50   :  { %738 = vmatmul.bf16.vlgmr.msrb.gmra.mxu3 %v122_v34 }
  0x52   :  { %s1087_s30 = spop %1086 }
  0x53   :  { %v743_v57 = vstv %s1087_s30 }
  0xaa   :  { %v648_v35 = vpop.f32.mrf.mxu0 }
  0xab   :  { %v661_v36 = vpop.f32.mrf.mxu1  ;;  %v649_v44 = vadd.f32 %v1097_v41, %v648_v35 }
  0xad   :  { %v662_v45 = vadd.f32 %v661_v36, %v649_v44 }
  0xb2   :  { %v674_v37 = vpop.f32.mrf.mxu2  ;;  %v650_v39 = vpop.f32.mrf.mxu0 }
  0xb3   :  { %v687_v38 = vpop.f32.mrf.mxu3  ;;  %v663_v40 = vpop.f32.mrf.mxu1  ;;  %v675_v46 = vadd.f32 %v674_v37, %v662_v45 }
  0xb5   :  { %v688_v47 = vadd.f32 %v687_v38, %v675_v46 }
  0xba   :  { %v676_v42 = vpop.f32.mrf.mxu2 }
  0xbb   :  { %v689_v43 = vpop.f32.mrf.mxu3 }
  0xca   :  { %v700_v48 = vpop.f32.mrf.mxu0 }
  0xcb   :  { %v713_v49 = vpop.f32.mrf.mxu1  ;;  %v701_v50 = vadd.f32 %v700_v48, %v688_v47 }
  0xcd   :  { %v714_v51 = vadd.f32 %v713_v49, %v701_v50 }
  0xd2   :  { %v726_v52 = vpop.f32.mrf.mxu2  ;;  %v702_v55 = vpop.f32.mrf.mxu0 }
  0xd3   :  { %v739_v53 = vpop.f32.mrf.mxu3  ;;  %v727_v54 = vadd.f32 %v726_v52, %v714_v51  ;;  %v715_v56 = vpop.f32.mrf.mxu1 }
  0xd5   :  { %v740_v58 = vadd.f32 %v739_v53, %v727_v54 }
  0xd7   :  { %v744_v59 = vmul.f32 %v743_v57, %v740_v58 }
  0xd9   :  { %745 = vst [vmem:[#allocation8] sm:$0xff] %v744_v59 }
  0xda   :  { %v728_v60 = vpop.f32.mrf.mxu2 }
  0xdb   :  { %v741_v61 = vpop.f32.mrf.mxu3 }
  0xdc   :  { %749 = vsyncadd [#allocation5], 96  ;;  %s752_s6 = sshll.u32 %s1231_s4, 4  ;;  %s1184_s7 = smov [#allocation8]   ;;  %s753_s6 = int_to_ptr.hbm [resolvable:$true] %s752_s6 }
  0xdd   :  { %s750_s8 = sshll.u32 %s1184_s7, 4  ;;  %s1185_s9 = smov 32   ;;  %s751_s8 = int_to_ptr.vmem [resolvable:$true] %s750_s8 }
  0xde   :  { %s1186_s10 = smov 2  }
  0xdf   :  { %758 = dma.vmem_to_hbm [thread:$0]  %s751_s8, 32, %s753_s6, [#allocation5], %s1185_s9, %s1185_s9, %s1186_s10  }
  0xe0   :  { %1176 = dma.done.wait [#allocation5], 128  }
  0xe1   :  { %1177 = vsyncadd [#allocation5], 4294967168 }
  0xe2   :  { %763 = vsyncpa [#allocation4], 1 }
  0xe3   :  { %764 = vsyncpa [#allocation7], 1 }
  0xe4   :  { %765 = vsyncpa [#allocation5], 1 }

</bundles_post_ra>
